<compile_context>
chip_gen: v6e
topology: v6e:2x2x1
jax: 0.10.0
libtpu: 0.0.40
codegen_flags: <defaults>
</compile_context>

<pallas_src>
import functools
import math

import jax
import jax.numpy as jnp
from jax.experimental import pallas as pl
from jax.experimental.pallas import tpu as pltpu


def _round_up(x, m):
    return ((x + m - 1) // m) * m


# ---------------------------------------------------------------------------
# Pre-pass: row-wise L2 normalization (== F.normalize(x, dim=-1), eps=1e-12).
# ---------------------------------------------------------------------------
def _l2_normalize_rows_kernel(x_ref, o_ref):
    x = x_ref[...].astype(jnp.float32)
    # x / max(||x||, eps)  ==  x * rsqrt(max(||x||^2, eps^2))
    inv = jax.lax.rsqrt(
        jnp.maximum(jnp.sum(x * x, axis=-1, keepdims=True), jnp.float32(1e-24)))
    o_ref[...] = x * inv


def _l2_normalize_rows(x, *, row_tile=256):
    rows, cols = x.shape
    if rows <= row_tile:
        tile, rows_pad = rows, rows
    else:
        tile = row_tile
        rows_pad = _round_up(rows, row_tile)
    xp = x if rows_pad == rows else jnp.pad(x, ((0, rows_pad - rows), (0, 0)))
    out = pl.pallas_call(
        _l2_normalize_rows_kernel,
        out_shape=jax.ShapeDtypeStruct((rows_pad, cols), jnp.float32),
        grid=(rows_pad // tile,),
        in_specs=[pl.BlockSpec((tile, cols), lambda i: (i, 0))],
        out_specs=pl.BlockSpec((tile, cols), lambda i: (i, 0)),
        compiler_params=pltpu.CompilerParams(dimension_semantics=("parallel",)),
    )(xp)
    return out[:rows] if rows_pad != rows else out


# ---------------------------------------------------------------------------
# Main kernel: cosine matmul + ArcFace margin + online cross-entropy.
# ---------------------------------------------------------------------------
def _arcface_loss_kernel(emb_ref, wt_ref, labels_ref, loss_ref,
                         m_scr, l_scr, t_scr,
                         *, scale, cos_m, sin_m, num_classes, class_tile):
    ci = pl.program_id(1)

    @pl.when(ci == 0)
    def _init():
        m_scr[...] = jnp.full_like(m_scr, -jnp.inf)
        l_scr[...] = jnp.zeros_like(l_scr)
        t_scr[...] = jnp.zeros_like(t_scr)

    # (TB, E) @ (E, TC) -> (TB, TC) on the MXU; inputs are pre-normalized.
    cosine = jnp.dot(emb_ref[...], wt_ref[...],
                     preferred_element_type=jnp.float32)
    cosine = jnp.clip(cosine, -1.0, 1.0)
    # cos(acos(c) + m) = c*cos(m) - sqrt(1 - c^2)*sin(m)
    sine = jnp.sqrt(jnp.maximum(1.0 - cosine * cosine, 0.0))
    logits = (cosine * cos_m - sine * sin_m) * scale            # (TB, TC)

    # Global class ids of this tile; mask class-padding columns to -inf so
    # they never contribute to the logsumexp.
    class_ids = (jax.lax.broadcasted_iota(jnp.int32, logits.shape, 1)
                 + ci * class_tile)
    logits = jnp.where(class_ids < num_classes, logits, -jnp.inf)

    # Target logit (each row's label lands in exactly one class tile).
    # Note: labels are kept as a tiny resident (TB,1) VMEM block; an SMEM
    # scalar-prefetch variant is possible but this block is negligible.
    one_hot = class_ids == labels_ref[...]                      # (TB, TC)
    t_scr[...] += jnp.sum(jnp.where(one_hot, logits, 0.0),
                          axis=-1, keepdims=True)

    # Online logsumexp across the class tiles (flash-attention style).
    m_prev = m_scr[...]
    m_new = jnp.maximum(m_prev, jnp.max(logits, axis=-1, keepdims=True))
    l_scr[...] = (jnp.exp(m_prev - m_new) * l_scr[...]
                  + jnp.sum(jnp.exp(logits - m_new), axis=-1, keepdims=True))
    m_scr[...] = m_new

    @pl.when(ci == pl.num_programs(1) - 1)
    def _finalize():
        # Per-row cross entropy: logsumexp(logits) - logit[label].
        loss_ref[...] = (m_scr[...] + jnp.log(l_scr[...])) - t_scr[...]


def _default_class_tile(num_classes, embed_dim, itemsize):
    # Keep the double-buffered (E, TC) weight tile around <= 8 MiB so it fits
    # scoped VMEM comfortably on every generation (v7x has only 64 MiB/TC).
    budget = 8 * 1024 * 1024
    tc = (budget // (2 * embed_dim * itemsize)) // 128 * 128
    tc = max(128, tc)
    return int(min(tc, 4096))


def arcface_loss(embeddings, weights, labels, *, scale=30.0, margin=0.5,
                 matmul_dtype=jnp.float32, batch_tile=256, class_tile=None):
    """embeddings (B,E) f32, weights (C,E) f32, labels (B,) int -> scalar loss.

    matmul_dtype=jnp.bfloat16 gives 2-4x MXU throughput at realistic sizes at
    the cost of some cosine precision near |cos|~1 (kept f32 by default so the
    result matches the f32 reference to tight tolerance).
    """
    B, E = embeddings.shape
    C, E2 = weights.shape
    assert E == E2 and labels.shape == (B,)

    # ---- pre-pass: normalize once, off the hot class loop ----
    emb_n = _l2_normalize_rows(embeddings).astype(matmul_dtype)     # (B, E)
    w_n = _l2_normalize_rows(weights)                               # (C, E)
    wt = w_n.T.astype(matmul_dtype)      # one-time transpose -> (E, C)

    # ---- tile sizes ----
    tb = B if B <= batch_tile else batch_tile
    b_pad = _round_up(B, tb)
    itemsize = jnp.dtype(matmul_dtype).itemsize
    if class_tile is None:
        class_tile = _default_class_tile(C, E, itemsize)
    tc = C if C <= class_tile else class_tile
    c_pad = _round_up(C, tc)

    # ---- padding (masked back out: classes via -inf, rows via [:B]) ----
    if b_pad != B:
        emb_n = jnp.pad(emb_n, ((0, b_pad - B), (0, 0)))
    if c_pad != C:
        wt = jnp.pad(wt, ((0, 0), (0, c_pad - C)))
    labels_2d = labels.astype(jnp.int32).reshape(-1, 1)
    if b_pad != B:
        labels_2d = jnp.pad(labels_2d, ((0, b_pad - B), (0, 0)),
                            constant_values=-1)

    kernel = functools.partial(
        _arcface_loss_kernel,
        scale=float(scale),
        cos_m=float(math.cos(margin)),
        sin_m=float(math.sin(margin)),
        num_classes=C,
        class_tile=tc,
    )

    # Rough scoped-VMEM budget (double-buffered inputs + lane-padded small
    # blocks + elementwise temporaries), clamped to the v7x physical ceiling.
    vmem_est = (2 * tb * E * itemsize + 2 * E * tc * itemsize
                + 7 * tb * 128 * 4 + 6 * tb * tc * 4)
    vmem_limit = int(min(max(32 << 20, 2 * vmem_est), 64 << 20))

    cost = pl.CostEstimate(
        flops=2 * b_pad * c_pad * E,
        transcendentals=2 * b_pad * c_pad,          # exp + sqrt per logit
        bytes_accessed=(b_pad * E + E * c_pad) * itemsize + b_pad * 8,
    )

    per_row = pl.pallas_call(
        kernel,
        out_shape=jax.ShapeDtypeStruct((b_pad, 1), jnp.float32),
        grid_spec=pltpu.PrefetchScalarGridSpec(
            num_scalar_prefetch=0,
            grid=(b_pad // tb, c_pad // tc),
            in_specs=[
                pl.BlockSpec((tb, E), lambda b, c: (b, 0)),   # embeddings
                pl.BlockSpec((E, tc), lambda b, c: (0, c)),   # weights (E,C)
                pl.BlockSpec((tb, 1), lambda b, c: (b, 0)),   # labels
            ],
            out_specs=pl.BlockSpec((tb, 1), lambda b, c: (b, 0)),
            scratch_shapes=[pltpu.VMEM((tb, 1), jnp.float32),   # running max
                            pltpu.VMEM((tb, 1), jnp.float32),   # running sumexp
                            pltpu.VMEM((tb, 1), jnp.float32)],  # target logit
        ),
        compiler_params=pltpu.CompilerParams(
            dimension_semantics=("parallel", "arbitrary"),
            vmem_limit_bytes=vmem_limit,
        ),
        cost_estimate=cost,
    )(emb_n, wt, labels_2d)

    # CrossEntropyLoss mean reduction over the real (un-padded) rows only.
    return jnp.mean(per_row[:B, 0])


def arcface_loss_ref(embeddings, weights, labels, *, scale=30.0, margin=0.5):
    """Pure-JAX reference of the PyTorch module forward."""
    eps = 1e-12
    e = embeddings / jnp.maximum(
        jnp.linalg.norm(embeddings, axis=-1, keepdims=True), eps)
    w = weights / jnp.maximum(
        jnp.linalg.norm(weights, axis=-1, keepdims=True), eps)
    cosine = jnp.clip(e @ w.T, -1.0, 1.0)
    theta = jnp.arccos(cosine) + margin
    logits = jnp.cos(theta) * scale
    log_probs = jax.nn.log_softmax(logits, axis=-1)
    return -jnp.mean(log_probs[jnp.arange(labels.shape[0]), labels])


if __name__ == "__main__":
    scale, margin = 30.0, 0.5
    key = jax.random.PRNGKey(0)

    # Config 1: tiny, single tile in both grid axes.
    # Config 2: forces multiple batch AND class tiles (exercises batch
    #           padding/masking, class padding -> -inf masking, and the online
    #           logsumexp accumulation), still small.
    configs = [
        dict(batch=8, embedding_size=32, num_classes=16,
             batch_tile=256, class_tile=None),
        dict(batch=260, embedding_size=32, num_classes=300,
             batch_tile=128, class_tile=128),
    ]

    for cfg in configs:
        b, e, c = cfg["batch"], cfg["embedding_size"], cfg["num_classes"]
        k_emb, k_w, k_lab, key = jax.random.split(key, 4)

        embeddings = jax.random.normal(k_emb, (b, e), dtype=jnp.float32)
        # nn.init.xavier_uniform_ on weights of shape (num_classes, emb_size).
        bound = (6.0 / (c + e)) ** 0.5
        weights = jax.random.uniform(k_w, (c, e), dtype=jnp.float32,
                                     minval=-bound, maxval=bound)
        labels = jax.random.randint(k_lab, (b,), 0, c, dtype=jnp.int32)

        loss = arcface_loss(embeddings, weights, labels, scale=scale,
                            margin=margin, batch_tile=cfg["batch_tile"],
                            class_tile=cfg["class_tile"])
        loss = jax.block_until_ready(loss)

        loss_ref = arcface_loss_ref(embeddings, weights, labels,
                                    scale=scale, margin=margin)
        assert jnp.allclose(loss, loss_ref, rtol=1e-5, atol=1e-5), (
            cfg, float(loss), float(loss_ref))

    print("KERNEL_OK")
</pallas_src>

<mosaic_0001>
module attributes {stable_mosaic.version = 11 : i64} {
  func.func @_l2_normalize_rows_kernel(%arg0: i32, %arg1: memref<8x32xf32, #tpu.memory_space<vmem>>, %arg2: memref<8x32xf32, #tpu.memory_space<vmem>>) attributes {dimension_semantics = [#tpu.dimension_semantics<parallel>], iteration_bounds = array<i64: 1>, scalar_prefetch = 0 : i64, scratch_operands = 0 : i64, tpu.core_type = #tpu.core_type<tc>, window_params = [{transform_indices = @transform_0, window_bounds = array<i64: 8, 32>}, {transform_indices = @transform_1, window_bounds = array<i64: 8, 32>}]} {
    %c0 = arith.constant 0 : index
    %c0_0 = arith.constant 0 : index
    %0 = vector.load %arg1[%c0, %c0_0] : memref<8x32xf32, #tpu.memory_space<vmem>>, vector<8x32xf32>
    %1 = arith.mulf %0, %0 : vector<8x32xf32>
    %cst = arith.constant dense<0.000000e+00> : vector<8xf32>
    %2 = vector.multi_reduction <add>, %1, %cst [1] : vector<8x32xf32> to vector<8xf32>
    %3 = vector.shape_cast %2 : vector<8xf32> to vector<8x1xf32>
    %cst_1 = arith.constant 1.000000e-24 : f32
    %4 = vector.broadcast %cst_1 : f32 to vector<8x1xf32>
    %5 = arith.maximumf %3, %4 : vector<8x1xf32>
    %6 = math.rsqrt %5 : vector<8x1xf32>
    %7 = vector.broadcast %6 : vector<8x1xf32> to vector<8x32xf32>
    %8 = arith.mulf %0, %7 : vector<8x32xf32>
    %c0_2 = arith.constant 0 : index
    %c0_3 = arith.constant 0 : index
    %9 = vector.load %arg2[%c0_2, %c0_3] : memref<8x32xf32, #tpu.memory_space<vmem>>, vector<8x32xf32>
    tpu.vector_store %arg2[%c0_2, %c0_3], %8 {strides = array<i32>} : memref<8x32xf32, #tpu.memory_space<vmem>>, vector<8x32xf32>,
    return
  }
  func.func @transform_0(%arg0: i32) -> (i32, i32) {
    %c0_i32 = arith.constant 0 : i32
    %c0_i32_0 = arith.constant 0 : i32
    return %arg0, %c0_i32 : i32, i32
  }
  func.func @transform_1(%arg0: i32) -> (i32, i32) {
    %c0_i32 = arith.constant 0 : i32
    %c0_i32_0 = arith.constant 0 : i32
    return %arg0, %c0_i32 : i32, i32
  }
}

</mosaic_0001>

<bundles_post_ra>
// kernel: tpu_custom_call.1
= control target key start
LH: loop header
LB: loop body
LE: loop exit
PB: predicated region body
PF: predicated region fallthrough
CT: control target
= control target key end

     0   :  { %6 = vsyncpa [#allocation3], 0  ;;  %s112_s0 = inlined_call_operand.hbm [shape: f32[8,32], index: 0, kind: input, shape index: {}]   ;;  %s113_s1 = inlined_call_operand.hbm [shape: f32[8,32], index: 1, kind: output, shape index: {}]  }
   0x1   :  { %7 = vsyncpa [#allocation4], 0  ;;  %s94_s6 = smov [#allocation2]  }
   0x2   :  { %s14_s7 = sshll.u32 %s94_s6, 4  ;;  %s15_s7 = int_to_ptr.vmem [resolvable:$true] %s14_s7 }
   0x3   :  { %s58_s8 = scalar_lea.vmem %s15_s7, 128  ;;  %p63_p1 = scmp.lt.s32.totalorder %s15_s7, %s15_s7 }
   0x4   :  { %p59_p0 = scmp.ne.s32.totalorder %s15_s7, %s58_s8  ;;  %p64_p2 = scmp.lt.s32.totalorder %s58_s8, %s58_s8 }
   0x6   :  { %p65_p3 = por %p64_p2, %p63_p1 }
   0x8   :  { %p66_p4 = pnand %p65_p3, %p59_p0 }
   0xa   :  { %69 = shalt.err (!%p66_p4)
}
   0xb   :  { %17 = dma.hbm_to_vmem [thread:$0]  %s112_s0, 128, %s15_s7, [#allocation3]  }
   0xc   :  { %90 = dma.done.wait [#allocation3], 128  }
   0xd   :  { %91 = vsyncadd [#allocation3], 4294967168  ;;  %v21_v0 = vld [vmem:[#allocation2] sm:$0xff]  ;;  %vm23_vm0 = vcmask 261120   ;;  %s95_s11 = smov [#allocation5]  }
   0xe   :  { %v22_v1 = vmul.f32 %v21_v0, %v21_v0  ;;  %s37_s12 = sshll.u32 %s95_s11, 4  ;;  %s38_s12 = int_to_ptr.vmem [resolvable:$true] %s37_s12 }
   0xf   :  { %s70_s13 = scalar_lea.vmem %s38_s12, 128  ;;  %p75_p6 = scmp.lt.s32.totalorder %s38_s12, %s38_s12 }
  0x10   :  { %v24_v2 = vsel %vm23_vm0, %v22_v1, 0.0  ;;  %p71_p5 = scmp.ne.s32.totalorder %s38_s12, %s70_s13  ;;  %p76_p7 = scmp.lt.s32.totalorder %s70_s13, %s70_s13 }
  0x11   :  { %25 = vadd.xlane.f32.xlu0 %v24_v2 }
  0x12   :  { %p77_p8 = por %p76_p7, %p75_p6 }
  0x14   :  { %p78_p9 = pnand %p77_p8, %p71_p5 }
  0x9a   :  { %v26_v3 = vpop.xlane.xlu0 %25 }
  0x9b   :  { %v27_v4 = vmax.f32 %v26_v3, 1e-24 }
  0x9d   :  { %48 = vrsqrt.f32 %v27_v4 }
  0xaa   :  { %v49_v5 = vpop.eup %48 }
  0xab   :  { %v29_v6 = vmul.f32 %v49_v5, %v21_v0 }
  0xad   :  { %30 = vst.msk [vmem:[#allocation5] sm:$0xff] %vm23_vm0, %v29_v6 }
  0xae   :  { %81 = shalt.err (!%p78_p9)
}
  0xaf   :  { %40 = dma.vmem_to_hbm [thread:$0]  %s38_s12, 128, %s113_s1, [#allocation4]  }
  0xb0   :  { %92 = dma.done.wait [#allocation4], 128  }
  0xb1   :  { %93 = vsyncadd [#allocation4], 4294967168 }
  0xb2   :  { %44 = vsyncpa [#allocation3], 1 }
  0xb3   :  { %45 = vsyncpa [#allocation4], 1 }

</bundles_post_ra>
